<compile_context>
chip_gen: v7x
topology: tpu7x:2x2x1
jax: 0.10.0
libtpu: 0.0.40
codegen_flags: <defaults>
</compile_context>

<pallas_src>
import functools

import jax
import jax.numpy as jnp
from jax import lax
from jax.experimental import pallas as pl
from jax.experimental.pallas import tpu as pltpu


def _round_up(x, m):
    return (x + m - 1) // m * m


@functools.lru_cache(maxsize=None)
def _roll_matches_jnp():
    """pltpu.roll follows jnp.roll's shift convention on current backends;
    verify once at runtime so the kernel's static shift constants stay robust."""
    def kern(x_ref, o_ref):
        o_ref[...] = pltpu.roll(x_ref[...], 1, 0)

    x = jnp.arange(8 * 128, dtype=jnp.float32).reshape(8, 128)
    y = pl.pallas_call(
        kern, out_shape=jax.ShapeDtypeStruct((8, 128), jnp.float32))(x)
    return bool(jnp.array_equal(y, jnp.roll(x, 1, 0)))


@functools.lru_cache(maxsize=None)
def _single_buffer_ok():
    """Probe pl.Buffered(1) (single-buffer grid-invariant weight blocks);
    fall back to default double-buffering on runtimes that reject it."""
    def kern(a_ref, w_ref, o_ref):
        o_ref[...] = a_ref[...] + w_ref[...]

    a = jnp.zeros((8, 128), jnp.float32)
    try:
        y = pl.pallas_call(
            kern,
            out_shape=jax.ShapeDtypeStruct((8, 128), jnp.float32),
            grid=(2,),
            in_specs=[pl.BlockSpec((8, 128), lambda i: (0, 0)),
                      pl.BlockSpec((8, 128), lambda i: (0, 0),
                                   pipeline_mode=pl.Buffered(1))],
            out_specs=pl.BlockSpec((8, 128), lambda i: (0, 0)),
        )(a, a)
        jax.block_until_ready(y)
        return True
    except Exception:
        return False


def _device_vmem_bytes():
    try:
        return int(pltpu.get_tpu_info().vmem_capacity_bytes)
    except Exception:
        return 64 * 2 ** 20  # conservative default (v7x per-TensorCore VMEM)


def bottleneck_kernel(x_ref, w1_ref, b1_ref, w2_ref, b2_ref, w3_ref, b3_ref,
                      o_ref, im_ref, *, true_w, jnp_roll):
    H, Wk, Cin = x_ref.shape          # Wk is the (multiple-of-8) kernel width
    P = w1_ref.shape[1]
    M = H * Wk
    f32 = jnp.float32
    cdt = im_ref.dtype                # bf16 MXU operand dtype

    def roll_fwd(v, k):
        # jnp.roll(v, k, axis=0) semantics for a static 0 < k < M shift,
        # robust to pltpu.roll's sign convention (probed host-side).
        return pltpu.roll(v, k if jnp_roll else M - k, 0)

    # Flat-row / column indices of the H x Wk spatial domain.
    rowm = lax.broadcasted_iota(jnp.int32, (M, P), 0)
    col = rowm % Wk

    # ---- conv1 (1x1, BN1 scale folded into w1) + bias + ReLU (f32) ----------
    h1 = jnp.dot(x_ref[...].reshape(M, Cin), w1_ref[...],
                 preferred_element_type=f32)
    h1 = jnp.maximum(h1 + b1_ref[...], 0.0)
    if Wk > true_w:
        # Host-padded columns carry zeros in x but relu(b1) in h1 -> zero them
        # so they act as the conv2 right-hand zero padding.
        h1 = jnp.where(col < true_w, h1, 0.0)

    # dx = -1 / +1 copies of h1 (f32 sublane rolls; the rows that crossed an
    # image-row boundary are zero either because they land in a zeroed pad
    # column (Wk > W) or via the explicit edge-column masks (Wk == W)).
    left = roll_fwd(h1, 1)            # value of column w-1 at position (h, w)
    right = roll_fwd(h1, M - 1)       # value of column w+1 at position (h, w)
    if Wk == true_w:
        left = jnp.where(col == 0, 0.0, left)
        right = jnp.where(col == true_w - 1, 0.0, right)

    # im2col along dx: pack the three copies into adjacent lane groups of the
    # scratch so conv2 contracts over K = 3P per dy tap.  The scratch is fully
    # rewritten every grid step (no persistent state -> megacore safe).
    im_ref[:, 0 * P:1 * P] = left.astype(cdt)
    im_ref[:, 1 * P:2 * P] = h1.astype(cdt)
    im_ref[:, 2 * P:3 * P] = right.astype(cdt)

    # ---- conv2 (3x3, stride 1, pad 1, BN2 folded) + bias + ReLU --------------
    # One MXU push per dy with K = 3P; the dy = +-1 taps are shifted by a whole
    # image row (Wk flat rows, sublane-aligned roll) on the f32 result and the
    # rows that would read across the top/bottom zero padding are masked.
    win = im_ref[...]                                              # (M, 3P) bf16
    t0 = jnp.dot(win, w2_ref[0], preferred_element_type=f32)      # dy = 0 (top)
    t1 = jnp.dot(win, w2_ref[1], preferred_element_type=f32)      # dy = 1
    t2 = jnp.dot(win, w2_ref[2], preferred_element_type=f32)      # dy = 2 (bottom)
    t0 = jnp.where(rowm >= Wk, roll_fwd(t0, Wk), 0.0)
    t2 = jnp.where(rowm < M - Wk, roll_fwd(t2, M - Wk), 0.0)
    h2 = jnp.maximum(t0 + t1 + t2 + b2_ref[...], 0.0).astype(w3_ref.dtype)

    # ---- conv3 (1x1, BN3 folded) + bias + residual + ReLU --------------------
    h3 = jnp.dot(h2, w3_ref[...], preferred_element_type=f32) + b3_ref[...]
    out = jnp.maximum(h3.reshape(H, Wk, Cin) + x_ref[...].astype(f32), 0.0)
    o_ref[...] = out.astype(o_ref.dtype)


def bottleneck_forward(x, w1, b1, w2, b2, w3, b3):
    N, H, W, Cin = x.shape
    P = w1.shape[1]
    assert Cin == 4 * P, "downsample=None requires inplanes == planes * 4"

    # Kernel width: multiple of 8 so every in-kernel reshape / store is aligned.
    Wk = _round_up(W, 8)
    if Wk != W:
        x = jnp.pad(x, ((0, 0), (0, 0), (0, Wk - W), (0, 0)))
    M = H * Wk

    # (3, 3, P, P) HWIO  ->  (dy, dx*P + cin, cout): one K = 3P matrix per dy.
    w2k = w2.reshape(3, 3 * P, P)

    kernel = functools.partial(bottleneck_kernel, true_w=W,
                               jnp_roll=_roll_matches_jnp())

    wmode = {"pipeline_mode": pl.Buffered(1)} if _single_buffer_ok() else {}
    nbuf_w = 1 if wmode else 2

    # VMEM budget: double-buffered x/out blocks + weights + scratch + live f32.
    x_blk = H * Wk * Cin * x.dtype.itemsize
    w_bytes = ((w1.size + w2k.size + w3.size) * w1.dtype.itemsize
               + (b1.size + b2.size + b3.size) * 4)
    scratch = M * 3 * P * 2
    live = (6 * M * P * 4            # h1, left, right, t0, t1, t2 (f32)
            + M * 3 * P * 2          # conv2 operand (bf16)
            + M * 4 * P * 4          # h3 (f32)
            + H * Wk * Cin * 4)      # residual / out (f32)
    est = 4 * x_blk + nbuf_w * w_bytes + scratch + live
    cap = _device_vmem_bytes() - 8 * 2 ** 20
    vmem_limit = int(max(16 * 2 ** 20, min(cap, max(32 * 2 ** 20, 2 * est))))
    # TODO(synk): if 2*est exceeds the device cap (huge H,W,planes), add a
    #             spatial row-tile grid axis instead of relying on the clamp.

    out = pl.pallas_call(
        kernel,
        out_shape=jax.ShapeDtypeStruct((N, H, Wk, Cin), x.dtype),
        grid_spec=pltpu.PrefetchScalarGridSpec(
            num_scalar_prefetch=0,
            grid=(N,),
            in_specs=[
                pl.BlockSpec((pl.Squeezed(), H, Wk, Cin), lambda n: (n, 0, 0, 0)),
                pl.BlockSpec((Cin, P),       lambda n: (0, 0), **wmode),
                pl.BlockSpec((1, P),         lambda n: (0, 0), **wmode),
                pl.BlockSpec((3, 3 * P, P),  lambda n: (0, 0, 0), **wmode),
                pl.BlockSpec((1, P),         lambda n: (0, 0), **wmode),
                pl.BlockSpec((P, 4 * P),     lambda n: (0, 0), **wmode),
                pl.BlockSpec((1, 4 * P),     lambda n: (0, 0), **wmode),
            ],
            out_specs=pl.BlockSpec((pl.Squeezed(), H, Wk, Cin),
                                   lambda n: (n, 0, 0, 0)),
            scratch_shapes=[pltpu.VMEM((M, 3 * P), jnp.bfloat16)],
        ),
        compiler_params=pltpu.CompilerParams(
            dimension_semantics=("parallel",),
            vmem_limit_bytes=vmem_limit),
    )(x, w1, b1, w2k, b2, w3, b3)

    if Wk != W:
        out = out[:, :, :W, :]
    return out


def reference_forward(x, w1, b1, w2, b2, w3, b3):
    """Pure-JAX NHWC reference (f32 math on the bf16-rounded inputs/weights)."""
    f32 = lambda a: a.astype(jnp.float32)
    hp = lax.Precision.HIGHEST
    xr = f32(x)
    h = jnp.einsum('nhwc,cp->nhwp', xr, f32(w1), precision=hp) + b1.reshape(1, 1, 1, -1)
    h = jax.nn.relu(h)
    h = lax.conv_general_dilated(h, f32(w2), (1, 1), 'SAME',
                                 dimension_numbers=('NHWC', 'HWIO', 'NHWC'),
                                 precision=hp) + b2.reshape(1, 1, 1, -1)
    h = jax.nn.relu(h)
    h = jnp.einsum('nhwp,pc->nhwc', h, f32(w3), precision=hp) + b3.reshape(1, 1, 1, -1)
    return jax.nn.relu(h + xr)


def make_params(key, inplanes, planes):
    """Conv weights in kernel layout with eval-mode BN folded in:
    scale -> multiplied into the conv output channels (then cast to bf16),
    bias  -> kept as a separate f32 (1, C) row."""
    eps = 1e-5
    ks = jax.random.split(key, 6)

    w1 = jax.random.normal(ks[0], (inplanes, planes), jnp.float32) * 0.1
    w2 = jax.random.normal(ks[1], (3, 3, planes, planes), jnp.float32) * 0.1
    w3 = jax.random.normal(ks[2], (planes, planes * 4), jnp.float32) * 0.1

    def bn_params(k, c):
        k0, k1, k2, k3 = jax.random.split(k, 4)
        gamma = 1.0 + 0.1 * jax.random.normal(k0, (c,), jnp.float32)
        beta = 0.1 * jax.random.normal(k1, (c,), jnp.float32)
        mean = 0.1 * jax.random.normal(k2, (c,), jnp.float32)
        var = jax.random.uniform(k3, (c,), jnp.float32, minval=0.5, maxval=1.5)
        scale = gamma / jnp.sqrt(var + eps)
        bias = beta - mean * scale
        return scale, bias

    s1, b1 = bn_params(ks[3], planes)
    s2, b2 = bn_params(ks[4], planes)
    s3, b3 = bn_params(ks[5], planes * 4)

    w1 = (w1 * s1[None, :]).astype(jnp.bfloat16)
    w2 = (w2 * s2[None, None, None, :]).astype(jnp.bfloat16)
    w3 = (w3 * s3[None, :]).astype(jnp.bfloat16)
    return (w1, b1.reshape(1, -1), w2, b2.reshape(1, -1), w3, b3.reshape(1, -1))


if __name__ == "__main__":
    key = jax.random.PRNGKey(0)

    def run_case(k, n, h, w, planes):
        inplanes = planes * 4
        kx, kp = jax.random.split(k)
        x = jax.random.normal(kx, (n, h, w, inplanes), jnp.float32).astype(jnp.bfloat16)
        params = make_params(kp, inplanes, planes)
        out = jax.block_until_ready(bottleneck_forward(x, *params))
        ref = reference_forward(x, *params)
        assert out.shape == (n, h, w, inplanes)
        err = float(jnp.max(jnp.abs(out.astype(jnp.float32) - ref)))
        assert err < 5e-2, (n, h, w, planes, err)
        return err

    k1, k2 = jax.random.split(key)
    # W % 8 == 0 path: no padded columns, edge-column masks on the dx rolls.
    run_case(k1, n=2, h=16, w=16, planes=4)
    # W % 8 != 0 path: host-padded width (Wk = 8), padded columns zero-masked.
    run_case(k2, n=2, h=7, w=7, planes=8)

    print("KERNEL_OK")
</pallas_src>

<mosaic_0001>
module attributes {stable_mosaic.version = 11 : i64} {
  func.func @kern(%arg0: memref<8x128xf32, #tpu.memory_space<vmem>>, %arg1: memref<8x128xf32, #tpu.memory_space<vmem>>) attributes {dimension_semantics = [], scalar_prefetch = 0 : i64, scratch_operands = 0 : i64, tpu.core_type = #tpu.core_type<tc>} {
    %c0 = arith.constant 0 : index
    %c0_0 = arith.constant 0 : index
    %0 = vector.load %arg0[%c0, %c0_0] : memref<8x128xf32, #tpu.memory_space<vmem>>, vector<8x128xf32>
    %c1_i32 = arith.constant 1 : i32
    %1 = tpu.dynamic_rotate %0 by %c1_i32 dim 0 : vector<8x128xf32>, i32 -> vector<8x128xf32>
    %c0_1 = arith.constant 0 : index
    %c0_2 = arith.constant 0 : index
    %2 = vector.load %arg1[%c0_1, %c0_2] : memref<8x128xf32, #tpu.memory_space<vmem>>, vector<8x128xf32>
    tpu.vector_store %arg1[%c0_1, %c0_2], %1 {strides = array<i32>} : memref<8x128xf32, #tpu.memory_space<vmem>>, vector<8x128xf32>,
    return
  }
}

</mosaic_0001>

<bundles_post_ra>
// kernel: tpu_custom_call.1
= control target key start
LH: loop header
LB: loop body
LE: loop exit
PB: predicated region body
PF: predicated region fallthrough
CT: control target
= control target key end

     0   :  { %6 = vsyncpa [#allocation3], 0  ;;  %s125_s0 = inlined_call_operand.hbm [shape: f32[8,128], index: 0, kind: input, shape index: {}]   ;;  %s126_s1 = inlined_call_operand.hbm [shape: f32[8,128], index: 1, kind: output, shape index: {}]  }
   0x1   :  { %7 = vsyncpa [#allocation4], 0  ;;  %s89_s6 = smov [#allocation2]   ;;  %s41_s10 = scalar_lea.hbm %s125_s0, 128 }
   0x2   :  { %s14_s7 = sshll.u32 %s89_s6, 4  ;;  %p42_p0 = scmp.ne.s32.totalorder %s125_s0, %s41_s10  ;;  %s15_s7 = int_to_ptr.vmem [resolvable:$true] %s14_s7 }
   0x3   :  { %p45_p1 = scmp.lt.u32.totalorder %s41_s10, %s125_s0 }
   0x5   :  { %p47_p2 = pnand %p45_p1, %p42_p0 }
   0x7   :  { %50 = shalt.err (!%p47_p2)
}
   0x8   :  { %s51_s15 = scalar_lea.vmem %s15_s7, 128  ;;  %p56_p4 = scmp.lt.s32.totalorder %s15_s7, %s15_s7 }
   0x9   :  { %p52_p3 = scmp.ne.s32.totalorder %s15_s7, %s51_s15  ;;  %p57_p5 = scmp.lt.s32.totalorder %s51_s15, %s51_s15 }
   0xb   :  { %p58_p6 = por %p57_p5, %p56_p4 }
   0xd   :  { %p59_p7 = pnand %p58_p6, %p52_p3 }
   0xf   :  { %62 = shalt.err (!%p59_p7)
}
  0x10   :  { %17 = dma.hbm_to_vmem [thread:$0]  %s125_s0, 128, %s15_s7, [#allocation3]  }
  0x11   :  { %85 = dma.done.wait [#allocation3], 128  }
  0x12   :  { %86 = vsyncadd [#allocation3], 4294967168  ;;  %s90_s18 = smov [#allocation5]   ;;  %v21_v0 = vld [vmem:[#allocation2] sm:$0xff] }
  0x13   :  { %s30_s19 = sshll.u32 %s90_s18, 4  ;;  %v22_v1 = vrot.slane %v21_v0, 7  ;;  %s31_s19 = int_to_ptr.vmem [resolvable:$true] %s30_s19 }
  0x14   :  { %s63_s20 = scalar_lea.vmem %s31_s19, 128  ;;  %p68_p9 = scmp.lt.s32.totalorder %s31_s19, %s31_s19 }
  0x15   :  { %23 = vst [vmem:[#allocation5] sm:$0xff] %v22_v1  ;;  %p64_p8 = scmp.ne.s32.totalorder %s31_s19, %s63_s20  ;;  %p69_p10 = scmp.lt.s32.totalorder %s63_s20, %s63_s20 }
  0x17   :  { %p70_p11 = por %p69_p10, %p68_p9 }
  0x19   :  { %p71_p12 = pnand %p70_p11, %p64_p8 }
  0x1b   :  { %74 = shalt.err (!%p71_p12)
}
  0x1c   :  { %s75_s23 = scalar_lea.hbm %s126_s1, 128 }
  0x1d   :  { %p76_p13 = scmp.ne.s32.totalorder %s126_s1, %s75_s23  ;;  %p79_p0 = scmp.lt.u32.totalorder %s75_s23, %s126_s1 }
  0x1f   :  { %p81_p1 = pnand %p79_p0, %p76_p13 }
  0x21   :  { %84 = shalt.err (!%p81_p1)
}
  0x22   :  { %33 = dma.vmem_to_hbm [thread:$0]  %s31_s19, 128, %s126_s1, [#allocation4]  }
  0x23   :  { %87 = dma.done.wait [#allocation4], 128  }
  0x24   :  { %88 = vsyncadd [#allocation4], 4294967168 }
  0x25   :  { %37 = vsyncpa [#allocation3], 1 }
  0x26   :  { %38 = vsyncpa [#allocation4], 1 }

</bundles_post_ra>
